<compile_context>
chip_gen: v6e
topology: v6e:2x2x1
jax: 0.10.0
libtpu: 0.0.40
codegen_flags: <defaults>
</compile_context>

<pallas_src>
import math

import jax
import jax.numpy as jnp
from jax.experimental import pallas as pl
from jax.experimental.pallas import tpu as pltpu

_SQRT_2_OVER_PI = math.sqrt(2.0 / math.pi)
_C1 = _SQRT_2_OVER_PI * 0.044715  # folded constant: sqrt(2/pi) * 0.044715

_TARGET_BLOCK_BYTES = 8 * 1024 * 1024     # ~8 MiB/block (x2 streams x2 bufs = 32 MiB)
_VMEM_LIMIT_BYTES = 48 * 1024 * 1024      # safe on v5e/v6e/v7x


def _gelu_kernel(x_ref, o_ref):
    # Upcast to f32 (no-op for f32 inputs); HBM-bound kernel -> VPU/EUP slack
    # makes the upcast and tanh free.
    x = x_ref[...].astype(jnp.float32)
    # sqrt(2/pi) * (x + 0.044715 x^3) == x * (sqrt(2/pi) + c1 * x^2)
    inner = x * (_SQRT_2_OVER_PI + _C1 * x * x)
    y = 0.5 * x * (1.0 + jnp.tanh(inner))
    o_ref[...] = y.astype(o_ref.dtype)


def _sublane_multiple(itemsize):
    # Sub-32-bit dtypes pack rows along sublanes: f32 -> 8, bf16/f16 -> 16,
    # int8/fp8 -> 32.  Row blocks aligned to this keep stores unmasked.
    return max(8, 32 // max(1, itemsize))


def _block_rows(rows, cols, itemsize):
    """Pick a row-block size targeting ~_TARGET_BLOCK_BYTES per block."""
    sub = _sublane_multiple(itemsize)
    if rows <= sub:
        return rows                       # single full-extent block
    tr = _TARGET_BLOCK_BYTES // max(1, cols * itemsize)
    tr = max(sub, (tr // sub) * sub)      # dtype-aware sublane alignment
    if tr >= rows:
        # Whole tensor would fit one block: split into >=2 blocks so the
        # "parallel" grid axis can be sharded across v7x's 2 TensorCores.
        if rows >= 2 * sub:
            half = (rows + 1) // 2
            tr = ((half + sub - 1) // sub) * sub
            tr = min(tr, rows)
        else:
            tr = rows
    return tr


def _pallas_gelu_2d(x2, tr):
    rows, cols = x2.shape
    grid = (pl.cdiv(rows, tr),)
    nbytes = x2.size * jnp.dtype(x2.dtype).itemsize
    cost = pl.CostEstimate(
        flops=10 * x2.size,
        transcendentals=x2.size,
        bytes_accessed=2 * nbytes,
    )
    return pl.pallas_call(
        _gelu_kernel,
        out_shape=jax.ShapeDtypeStruct((rows, cols), x2.dtype),
        grid_spec=pltpu.PrefetchScalarGridSpec(
            num_scalar_prefetch=0,
            grid=grid,
            in_specs=[pl.BlockSpec((tr, cols), lambda i: (i, 0))],
            out_specs=pl.BlockSpec((tr, cols), lambda i: (i, 0)),
        ),
        compiler_params=pltpu.CompilerParams(
            dimension_semantics=("parallel",),
            vmem_limit_bytes=_VMEM_LIMIT_BYTES,
        ),
        cost_estimate=cost,
    )(x2)


def _gelu_lane_dense(x_flat):
    """GELU over a flat array whose size is a multiple of 128 (lane-dense)."""
    n = x_flat.size
    itemsize = jnp.dtype(x_flat.dtype).itemsize
    lane_w = 128
    for w in (4096, 2048, 1024, 512, 256):
        if n % w == 0:
            lane_w = w
            break
    rows = n // lane_w
    x2 = x_flat.reshape(rows, lane_w)
    tr = _block_rows(rows, lane_w, itemsize)
    return _pallas_gelu_2d(x2, tr).reshape(-1)


@jax.jit
def gelu_pallas(x):
    orig_shape = x.shape
    n = x.size
    if n == 0:
        return x
    x_flat = x.reshape(-1)
    tail = n % 128

    if tail == 0:
        # Fast path: fully lane-dense slab, no copies.
        return _gelu_lane_dense(x_flat).reshape(orig_shape)

    # Ragged path: lane-dense main body + tiny (<128 element) tail call.
    n_main = n - tail
    tail_out = _pallas_gelu_2d(x_flat[n_main:].reshape(1, tail), 1).reshape(-1)
    if n_main == 0:
        return tail_out.reshape(orig_shape)
    main_out = _gelu_lane_dense(x_flat[:n_main])
    return jnp.concatenate([main_out, tail_out]).reshape(orig_shape)


def gelu_ref_f32(x):
    xf = x.astype(jnp.float32)
    c = jnp.float32(_SQRT_2_OVER_PI)
    return 0.5 * xf * (1.0 + jnp.tanh(c * (xf + 0.044715 * jnp.power(xf, 3))))


if __name__ == "__main__":
    key = jax.random.PRNGKey(0)

    # GPT-style input: (batch=2, seq=8, hidden=32), f32 — lane-dense path.
    x = jax.random.normal(key, (2, 8, 32), dtype=jnp.float32)
    out = jax.block_until_ready(gelu_pallas(x))
    ref = gelu_ref_f32(x)
    assert out.shape == x.shape and out.dtype == x.dtype
    assert jnp.allclose(out, ref, atol=1e-5, rtol=1e-5)

    # bf16 input (kernel computes in f32 internally).
    xb = x.astype(jnp.bfloat16)
    outb = jax.block_until_ready(gelu_pallas(xb))
    refb = gelu_ref_f32(xb)
    assert outb.shape == xb.shape and outb.dtype == xb.dtype
    assert jnp.allclose(outb.astype(jnp.float32), refb, atol=2e-2, rtol=2e-2)

    # Tiny odd shape (105 elements, < 128) — tail-only path.
    xo = jax.random.normal(jax.random.PRNGKey(1), (3, 5, 7), dtype=jnp.float32)
    outo = jax.block_until_ready(gelu_pallas(xo))
    assert outo.shape == xo.shape
    assert jnp.allclose(outo, gelu_ref_f32(xo), atol=1e-5, rtol=1e-5)

    # Odd shape not a multiple of 128 (7*130 = 910 = 896 + 14) — split path.
    xs = jax.random.normal(jax.random.PRNGKey(2), (7, 130), dtype=jnp.float32)
    outs = jax.block_until_ready(gelu_pallas(xs))
    assert outs.shape == xs.shape
    assert jnp.allclose(outs, gelu_ref_f32(xs), atol=1e-5, rtol=1e-5)

    print("KERNEL_OK")
</pallas_src>

<mosaic_0001>
module attributes {stable_mosaic.version = 11 : i64} {
  func.func @_gelu_kernel(%arg0: i32, %arg1: memref<1x512xf32, #tpu.memory_space<vmem>>, %arg2: memref<1x512xf32, #tpu.memory_space<vmem>>) attributes {dimension_semantics = [#tpu.dimension_semantics<parallel>], iteration_bounds = array<i64: 1>, scalar_prefetch = 0 : i64, scratch_operands = 0 : i64, tpu.core_type = #tpu.core_type<tc>, window_params = [{transform_indices = @transform_0, window_bounds = array<i64: 1, 512>}, {transform_indices = @transform_1, window_bounds = array<i64: 1, 512>}]} {
    %c0 = arith.constant 0 : index
    %c0_0 = arith.constant 0 : index
    %0 = vector.load %arg1[%c0, %c0_0] : memref<1x512xf32, #tpu.memory_space<vmem>>, vector<1x512xf32>
    %cst = arith.constant 0.0356774069 : f32
    %1 = vector.broadcast %cst : f32 to vector<1x512xf32>
    %2 = arith.mulf %1, %0 : vector<1x512xf32>
    %3 = arith.mulf %2, %0 : vector<1x512xf32>
    %cst_1 = arith.constant 0.797884583 : f32
    %4 = vector.broadcast %cst_1 : f32 to vector<1x512xf32>
    %5 = arith.addf %4, %3 : vector<1x512xf32>
    %6 = arith.mulf %0, %5 : vector<1x512xf32>
    %cst_2 = arith.constant 5.000000e-01 : f32
    %7 = vector.broadcast %cst_2 : f32 to vector<1x512xf32>
    %8 = arith.mulf %7, %0 : vector<1x512xf32>
    %9 = math.tanh %6 : vector<1x512xf32>
    %cst_3 = arith.constant 1.000000e+00 : f32
    %10 = vector.broadcast %cst_3 : f32 to vector<1x512xf32>
    %11 = arith.addf %10, %9 : vector<1x512xf32>
    %12 = arith.mulf %8, %11 : vector<1x512xf32>
    %c0_4 = arith.constant 0 : index
    %c0_5 = arith.constant 0 : index
    %13 = vector.load %arg2[%c0_4, %c0_5] : memref<1x512xf32, #tpu.memory_space<vmem>>, vector<1x512xf32>
    tpu.vector_store %arg2[%c0_4, %c0_5], %12 {strides = array<i32>} : memref<1x512xf32, #tpu.memory_space<vmem>>, vector<1x512xf32>,
    return
  }
  func.func @transform_0(%arg0: i32) -> (i32, i32) {
    %c0_i32 = arith.constant 0 : i32
    %c0_i32_0 = arith.constant 0 : i32
    return %arg0, %c0_i32 : i32, i32
  }
  func.func @transform_1(%arg0: i32) -> (i32, i32) {
    %c0_i32 = arith.constant 0 : i32
    %c0_i32_0 = arith.constant 0 : i32
    return %arg0, %c0_i32 : i32, i32
  }
}

</mosaic_0001>

<bundles_post_ra>
// kernel: gelu_pallas.1
= control target key start
LH: loop header
LB: loop body
LE: loop exit
PB: predicated region body
PF: predicated region fallthrough
CT: control target
= control target key end

     0   :  { %v17_v5 = vlaneseq  ;;  %s44_s0 = inlined_call_operand.vmem [shape: f32[1,512], index: 0, kind: input, shape index: {}]   ;;  %s45_s1 = inlined_call_operand.vmem [shape: f32[1,512], index: 1, kind: output, shape index: {}]  }
   0x1   :  { %v8_v0 = vld [vmem:[%s44_s0] sm:$0xf] }
   0x2   :  { %v9_v1 = vmul.f32 0.035677407, %v8_v0  ;;  %v13_v6 = vmul.f32 0.5, %v8_v0  ;;  %vm19_vm0 = vcmp.lt.s32.totalorder %v17_v5, 512 }
   0x4   :  { %v10_v2 = vmul.f32 %v9_v1, %v8_v0 }
   0x6   :  { %v11_v3 = vadd.f32 0.7978846, %v10_v2 }
   0x8   :  { %v12_v4 = vmul.f32 %v11_v3, %v8_v0 }
   0xa   :  { %26 = vtanh.f32 %v12_v4 }
  0x17   :  { %v27_v7 = vpop.eup %26 }
  0x18   :  { %v15_v8 = vadd.f32 1.0, %v27_v7 }
  0x1a   :  { %v16_v9 = vmul.f32 %v15_v8, %v13_v6 }
  0x1c   :  { %21 = vst.msk [vmem:[%s45_s1] sm:$0xf] %vm19_vm0, %v16_v9 }

</bundles_post_ra>
